<compile_context>
chip_gen: v6e
topology: v6e:2x2x1
jax: 0.10.0
libtpu: 0.0.40
codegen_flags: <defaults>
</compile_context>

<pallas_src>
import functools

import jax
import jax.numpy as jnp
from jax import lax
from jax.experimental import pallas as pl
from jax.experimental.pallas import tpu as pltpu

LN_EPS = 1e-5  # torch.nn.LayerNorm default

SINGLE_STEP_MAX = 512   # below this, launch/DMA latency dominates: one grid step
ROW_TILE_CAP = 2048     # per-step row cap at large B (HBM-bound regime)


def fc_embedding_kernel(x_ref, w_ref, b_ref, o_ref):
    # x_ref: (bm, T) token ids (int32) -> cast to f32
    # w_ref: (T, D)  fused weight  gamma[:,None] * W^T   (VMEM-resident across grid)
    # b_ref: (1, D)  fused bias    b + beta @ W^T         (VMEM-resident)
    # o_ref: (bm, D) output
    x = x_ref[...].astype(jnp.float32)
    T = x.shape[-1]
    inv_t = jnp.float32(1.0 / T)  # static constant, no divides in the hot path

    # LayerNorm over the last (T) axis: two independent reductions issued up
    # front (they can overlap on the XLU), var via E[x^2] - mean^2.
    s1 = jnp.sum(x, axis=-1, keepdims=True)
    s2 = jnp.sum(x * x, axis=-1, keepdims=True)
    mean = s1 * inv_t
    var = jnp.maximum(s2 * inv_t - mean * mean, 0.0)  # clamp: guards constant rows
    xhat = (x - mean) * lax.rsqrt(var + LN_EPS)

    # Linear (+ folded LN affine) + bias + ReLU on the MXU.
    y = jnp.dot(xhat, w_ref[...], preferred_element_type=jnp.float32)
    y = y + b_ref[...]
    o_ref[...] = jnp.maximum(y, 0.0).astype(o_ref.dtype)
    # TODO(synk): Dropout(0.1) is identity in eval mode; training-mode dropout
    # (pltpu.prng_random_bits mask) intentionally omitted.


def _round_up(n, m):
    return ((n + m - 1) // m) * m


def _choose_tiling(B):
    """Returns (bm, padded_B) with padded_B % bm == 0 and bm % 8 == 0."""
    if B <= SINGLE_STEP_MAX:
        # Latency-bound regime: a single grid step (pad rows to a sublane multiple).
        bm = _round_up(max(B, 8), 8)
        return bm, bm
    # Throughput regime: keep >= 2 grid steps so v7x's two TensorCores both get
    # work; each step handles at most ROW_TILE_CAP rows to amortize the
    # ~0.35us/step overhead while staying well inside scoped VMEM.
    n_steps = max(2, pl.cdiv(B, ROW_TILE_CAP))
    bm = _round_up(pl.cdiv(B, n_steps), 8)
    return bm, bm * n_steps


@functools.partial(jax.jit, static_argnames=("bm", "out_dtype"))
def _fc_embedding_call(token_ids, w_fused, b_fused, *, bm, out_dtype):
    B, T = token_ids.shape
    Tw, D = w_fused.shape
    assert Tw == T and B % bm == 0

    return pl.pallas_call(
        fc_embedding_kernel,
        out_shape=jax.ShapeDtypeStruct((B, D), out_dtype),
        grid_spec=pltpu.PrefetchScalarGridSpec(
            num_scalar_prefetch=0,
            grid=(B // bm,),  # row-only grid; full D per step so LN runs once/row
            in_specs=[
                pl.BlockSpec((bm, T), lambda i: (i, 0)),  # token_ids row block
                pl.BlockSpec((T, D), lambda i: (0, 0)),   # fused W^T (resident)
                pl.BlockSpec((1, D), lambda i: (0, 0)),   # fused bias (resident)
            ],
            out_specs=pl.BlockSpec((bm, D), lambda i: (i, 0)),
        ),
        compiler_params=pltpu.CompilerParams(
            dimension_semantics=("parallel",),
            vmem_limit_bytes=32 * 1024 * 1024,  # headroom for bm up to 2048
        ),
    )(token_ids, w_fused, b_fused)


def fc_embedding(token_ids, w_fused, b_fused, *, out_dtype=jnp.float32):
    """Forward pass. Expects params already prepared by prepare_params()."""
    B = token_ids.shape[0]
    bm, padded_B = _choose_tiling(B)
    if padded_B != B:
        # Zero-pad extra rows (LN of an all-zero row is finite thanks to eps);
        # they are sliced off below. Avoids whole-array fallback blocks.
        token_ids = jnp.pad(token_ids, ((0, padded_B - B), (0, 0)))
    out = _fc_embedding_call(token_ids, w_fused, b_fused, bm=bm, out_dtype=out_dtype)
    return out[:B] if padded_B != B else out


def prepare_params(w, b, gamma, beta):
    """One-time layout prep + LN-affine folding (outside the per-call path).

    w: (D, T) nn.Linear weight; b: (D,); gamma/beta: (T,) nn.LayerNorm params.
    Returns (w_fused, b_fused):
        w_fused[t, d] = gamma[t] * w[d, t]
        b_fused       = b + beta @ w^T            (shape (1, D))
    so that  (xhat*gamma + beta) @ w^T + b == xhat @ w_fused + b_fused.
    """
    w_t = w.T                                   # (T, D)
    w_fused = w_t * gamma[:, None]              # (T, D)
    b_fused = (b + beta @ w_t).reshape(1, -1)   # (1, D)
    return w_fused, b_fused


def fc_embedding_ref(token_ids, w, b, gamma, beta):
    """Pure-JAX reference with the original (unfused) parameters."""
    x = token_ids.astype(jnp.float32)
    mean = jnp.mean(x, axis=-1, keepdims=True)
    var = jnp.mean((x - mean) ** 2, axis=-1, keepdims=True)
    xn = (x - mean) / jnp.sqrt(var + LN_EPS) * gamma + beta
    y = xn @ w.T + b
    return jnp.maximum(y, 0.0)


if __name__ == "__main__":
    # Module config (small, consistent with the forward):
    max_num_token = 128   # T  (LayerNorm / Linear input dim)
    embedding_dim = 256   # D
    batch = 16            # B

    key = jax.random.PRNGKey(0)
    k_ids, k_w, k_b, k_g, k_be = jax.random.split(key, 5)

    # Deterministic synthetic parameters (PyTorch-style uniform init bounds).
    bound = 1.0 / (max_num_token ** 0.5)
    w = jax.random.uniform(k_w, (embedding_dim, max_num_token),
                           jnp.float32, -bound, bound)   # nn.Linear weight (D, T)
    b = jax.random.uniform(k_b, (embedding_dim,), jnp.float32, -bound, bound)
    # Non-trivial LN affine so the gamma/beta folding is actually exercised.
    gamma = 1.0 + 0.1 * jax.random.uniform(k_g, (max_num_token,), jnp.float32, -1.0, 1.0)
    beta = 0.05 * jax.random.normal(k_be, (max_num_token,), jnp.float32)

    # "token_ids": integer input, cast to float inside the forward.
    token_ids = jax.random.randint(k_ids, (batch, max_num_token), 0, 1000,
                                   dtype=jnp.int32)

    # One-time parameter layout prep + LN folding.
    w_fused, b_fused = prepare_params(w, b, gamma, beta)

    out = fc_embedding(token_ids, w_fused, b_fused)
    out = jax.block_until_ready(out)

    ref = fc_embedding_ref(token_ids, w, b, gamma, beta)
    assert out.shape == (batch, embedding_dim)
    assert jnp.allclose(out, ref, atol=1e-4, rtol=1e-4), "mismatch vs reference"

    # Also exercise the row-padding path (B not a multiple of 8).
    token_ids_odd = token_ids[:13]
    out_odd = jax.block_until_ready(fc_embedding(token_ids_odd, w_fused, b_fused))
    ref_odd = fc_embedding_ref(token_ids_odd, w, b, gamma, beta)
    assert out_odd.shape == (13, embedding_dim)
    assert jnp.allclose(out_odd, ref_odd, atol=1e-4, rtol=1e-4), "padded-path mismatch"

    print("KERNEL_OK")
</pallas_src>

<mosaic_0001>
module attributes {stable_mosaic.version = 11 : i64} {
  func.func @fc_embedding_kernel(%arg0: i32, %arg1: memref<16x128xi32, #tpu.memory_space<vmem>>, %arg2: memref<128x256xf32, #tpu.memory_space<vmem>>, %arg3: memref<1x256xf32, #tpu.memory_space<vmem>>, %arg4: memref<16x256xf32, #tpu.memory_space<vmem>>) attributes {dimension_semantics = [#tpu.dimension_semantics<parallel>], iteration_bounds = array<i64: 1>, scalar_prefetch = 0 : i64, scratch_operands = 0 : i64, tpu.core_type = #tpu.core_type<tc>, window_params = [{transform_indices = @transform_0, window_bounds = array<i64: 16, 128>}, {pipeline_mode = #tpu.pipeline_mode<synchronous>, transform_indices = @transform_1, window_bounds = array<i64: 128, 256>}, {pipeline_mode = #tpu.pipeline_mode<synchronous>, transform_indices = @transform_2, window_bounds = array<i64: 1, 256>}, {transform_indices = @transform_3, window_bounds = array<i64: 16, 256>}]} {
    %c0 = arith.constant 0 : index
    %c0_0 = arith.constant 0 : index
    %0 = vector.load %arg1[%c0, %c0_0] : memref<16x128xi32, #tpu.memory_space<vmem>>, vector<16x128xi32>
    %1 = arith.sitofp %0 : vector<16x128xi32> to vector<16x128xf32>
    %cst = arith.constant dense<0.000000e+00> : vector<16xf32>
    %2 = vector.multi_reduction <add>, %1, %cst [1] : vector<16x128xf32> to vector<16xf32>
    %3 = vector.shape_cast %2 : vector<16xf32> to vector<16x1xf32>
    %4 = arith.mulf %1, %1 : vector<16x128xf32>
    %cst_1 = arith.constant dense<0.000000e+00> : vector<16xf32>
    %5 = vector.multi_reduction <add>, %4, %cst_1 [1] : vector<16x128xf32> to vector<16xf32>
    %6 = vector.shape_cast %5 : vector<16xf32> to vector<16x1xf32>
    %cst_2 = arith.constant 7.812500e-03 : f32
    %7 = vector.broadcast %cst_2 : f32 to vector<16x1xf32>
    %8 = arith.mulf %3, %7 : vector<16x1xf32>
    %cst_3 = arith.constant 7.812500e-03 : f32
    %9 = vector.broadcast %cst_3 : f32 to vector<16x1xf32>
    %10 = arith.mulf %6, %9 : vector<16x1xf32>
    %11 = arith.mulf %8, %8 : vector<16x1xf32>
    %12 = arith.subf %10, %11 : vector<16x1xf32>
    %cst_4 = arith.constant 0.000000e+00 : f32
    %13 = vector.broadcast %cst_4 : f32 to vector<16x1xf32>
    %14 = arith.maximumf %12, %13 : vector<16x1xf32>
    %15 = vector.broadcast %8 : vector<16x1xf32> to vector<16x128xf32>
    %16 = arith.subf %1, %15 : vector<16x128xf32>
    %cst_5 = arith.constant 9.99999974E-6 : f32
    %17 = vector.broadcast %cst_5 : f32 to vector<16x1xf32>
    %18 = arith.addf %14, %17 : vector<16x1xf32>
    %19 = math.rsqrt %18 : vector<16x1xf32>
    %20 = vector.broadcast %19 : vector<16x1xf32> to vector<16x128xf32>
    %21 = arith.mulf %16, %20 : vector<16x128xf32>
    %c0_6 = arith.constant 0 : index
    %c0_7 = arith.constant 0 : index
    %22 = vector.load %arg2[%c0_6, %c0_7] : memref<128x256xf32, #tpu.memory_space<vmem>>, vector<128x256xf32>
    %cst_8 = arith.constant dense<0.000000e+00> : vector<16x256xf32>
    %23 = tpu.matmul %21, %22, %cst_8 {dimension_numbers = #tpu.dot_dimension_numbers<[1], [0], [0], [1], [0, 0, 1, 1], [], []>} : vector<16x128xf32>, vector<128x256xf32>, vector<16x256xf32> -> vector<16x256xf32>
    %c0_9 = arith.constant 0 : index
    %c0_10 = arith.constant 0 : index
    %24 = vector.load %arg3[%c0_9, %c0_10] : memref<1x256xf32, #tpu.memory_space<vmem>>, vector<1x256xf32>
    %25 = vector.broadcast %24 : vector<1x256xf32> to vector<16x256xf32>
    %26 = arith.addf %23, %25 : vector<16x256xf32>
    %cst_11 = arith.constant 0.000000e+00 : f32
    %27 = vector.broadcast %cst_11 : f32 to vector<16x256xf32>
    %28 = arith.maximumf %26, %27 : vector<16x256xf32>
    %c0_12 = arith.constant 0 : index
    %c0_13 = arith.constant 0 : index
    %29 = vector.load %arg4[%c0_12, %c0_13] : memref<16x256xf32, #tpu.memory_space<vmem>>, vector<16x256xf32>
    tpu.vector_store %arg4[%c0_12, %c0_13], %28 {strides = array<i32>} : memref<16x256xf32, #tpu.memory_space<vmem>>, vector<16x256xf32>,
    return
  }
  func.func @transform_0(%arg0: i32) -> (i32, i32) {
    %c0_i32 = arith.constant 0 : i32
    %c0_i32_0 = arith.constant 0 : i32
    return %arg0, %c0_i32 : i32, i32
  }
  func.func @transform_1(%arg0: i32) -> (i32, i32) {
    %c0_i32 = arith.constant 0 : i32
    %c0_i32_0 = arith.constant 0 : i32
    %c0_i32_1 = arith.constant 0 : i32
    return %c0_i32, %c0_i32_0 : i32, i32
  }
  func.func @transform_2(%arg0: i32) -> (i32, i32) {
    %c0_i32 = arith.constant 0 : i32
    %c0_i32_0 = arith.constant 0 : i32
    %c0_i32_1 = arith.constant 0 : i32
    return %c0_i32, %c0_i32_0 : i32, i32
  }
  func.func @transform_3(%arg0: i32) -> (i32, i32) {
    %c0_i32 = arith.constant 0 : i32
    %c0_i32_0 = arith.constant 0 : i32
    return %arg0, %c0_i32 : i32, i32
  }
}

</mosaic_0001>

<bundles_post_ra>
// kernel: _fc_embedding_call.1
= control target key start
LH: loop header
LB: loop body
LE: loop exit
PB: predicated region body
PF: predicated region fallthrough
CT: control target
= control target key end

     0   :  { %8 = vsyncpa [#allocation3], 0  ;;  %s390_s0 = inlined_call_operand.hbm [shape: s32[16,128], index: 0, kind: input, shape index: {}]   ;;  %s391_s1 = inlined_call_operand.hbm [shape: f32[128,256], index: 1, kind: input, shape index: {}]   ;;  %s392_s2 = inlined_call_operand.vmem [shape: f32[1,256], index: 2, kind: input, shape index: {}]   ;;  %s393_s3 = inlined_call_operand.hbm [shape: f32[16,256], index: 3, kind: output, shape index: {}]  }
   0x1   :  { %9 = vsyncpa [#allocation6], 0 }
   0x2   :  { %10 = vsyncpa [#allocation4], 0  ;;  %s332_s12 = smov [#allocation2]  }
   0x3   :  { %s16_s13 = sshll.u32 %s332_s12, 4  ;;  %s17_s13 = int_to_ptr.vmem [resolvable:$true] %s16_s13 }
   0x4   :  { %s274_s14 = scalar_lea.vmem %s17_s13, 256  ;;  %p279_p1 = scmp.lt.s32.totalorder %s17_s13, %s17_s13 }
   0x5   :  { %p275_p0 = scmp.ne.s32.totalorder %s17_s13, %s274_s14  ;;  %p280_p2 = scmp.lt.s32.totalorder %s274_s14, %s274_s14 }
   0x7   :  { %p281_p3 = por %p280_p2, %p279_p1 }
   0x9   :  { %p282_p4 = pnand %p281_p3, %p275_p0 }
   0xb   :  { %285 = shalt.err (!%p282_p4)
}
   0xc   :  { %s333_s15 = smov 128   ;;  %s334_s16 = smov 8  }
   0xd   :  { %22 = dma.hbm_to_vmem [thread:$0]  %s390_s0, 256, %s17_s13, [#allocation3], %s333_s15, %s333_s15, %s334_s16  }
   0xe   :  { %s335_s19 = smov [#allocation5]  }
   0xf   :  { %s28_s20 = sshll.u32 %s335_s19, 4  ;;  %s29_s20 = int_to_ptr.vmem [resolvable:$true] %s28_s20 }
  0x10   :  { %s294_s21 = scalar_lea.vmem %s29_s20, 4096  ;;  %p299_p6 = scmp.lt.s32.totalorder %s29_s20, %s29_s20 }
  0x11   :  { %p295_p5 = scmp.ne.s32.totalorder %s29_s20, %s294_s21  ;;  %p300_p7 = scmp.lt.s32.totalorder %s294_s21, %s294_s21 }
  0x13   :  { %p301_p8 = por %p300_p7, %p299_p6 }
  0x15   :  { %p302_p9 = pnand %p301_p8, %p295_p5 }
  0x17   :  { %305 = shalt.err (!%p302_p9)
}
  0x18   :  { %s336_s22 = smov 256   ;;  %s337_s23 = smov 16  }
  0x19   :  { %34 = dma.hbm_to_vmem [thread:$0]  %s391_s1, 4096, %s29_s20, [#allocation6], %s336_s22, %s336_s22, %s337_s23  }
  0x1a   :  { %326 = dma.done.wait [#allocation3], 256  }
  0x1b   :  { %327 = vsyncadd [#allocation3], 4294967040 }
  0x1c   :  { %328 = dma.done.wait [#allocation6], 4096  }
  0x1d   :  { %329 = vsyncadd [#allocation6], 4294963200  ;;  %v43_v0 = vld [vmem:[#allocation2] sm:$0xff]  ;;  %v44_v1 = vld [vmem:[#allocation2 + $0x8] sm:$0xff]  ;;  %v338_v38 = vmov 0.0   ;;  %v109_v61 = vlaneseq  ;;  %s339_s26 = smov [#allocation7]  }
  0x1e   :  { %v106_v2 = vld [vmem:[#allocation5 + $0xf8] sm:$0xff]  ;;  %v369_v3 = vcvt.s32.f32 %v43_v0  ;;  %v371_v4 = vcvt.s32.f32 %v44_v1  ;;  %v105_v5 = vld [vmem:[#allocation5 + $0xf0] sm:$0xff]  ;;  %v104_v6 = vld [vmem:[#allocation5 + $0xe8] sm:$0xff]  ;;  %183 = vmatprep.mubr.f32.mxu0 %v338_v38  ;;  %189 = vmatprep.mubr.f32.mxu1 %v338_v38  ;;  %s209_s27 = sshll.u32 %s339_s26, 4  ;;  %s210_s27 = int_to_ptr.vmem [resolvable:$true] %s209_s27 }
  0x1f   :  { %119 = vmatprep.subr.mxu0 %v106_v2  ;;  %v103_v7 = vld [vmem:[#allocation5 + $0xe0] sm:$0xff]  ;;  %222 = vmatprep.subr.mxu1 %v106_v2  ;;  %v102_v8 = vld [vmem:[#allocation5 + $0xd8] sm:$0xff]  ;;  %v101_v10 = vld [vmem:[#allocation5 + $0xd0] sm:$0xff]  ;;  %v110_v62 = vshrl.u32 %v109_v61, 7  ;;  %p311_p11 = scmp.lt.s32.totalorder %s210_s27, %s210_s27 }
  0x20   :  { %120 = vmatpush1.msra.mxu0 %v105_v5  ;;  %238 = vmatpush1.msra.mxu1 %v105_v5  ;;  %v51_v9 = vmul.f32 %v369_v3, %v369_v3  ;;  %v52_v11 = vmul.f32 %v371_v4, %v371_v4  ;;  %v100_v12 = vld [vmem:[#allocation5 + $0xc8] sm:$0xff]  ;;  %v99_v13 = vld [vmem:[#allocation5 + $0xc0] sm:$0xff]  ;;  %v98_v14 = vld [vmem:[#allocation5 + $0xb8] sm:$0xff] }
  0x21   :  { %47 = vadd.xlane.f32.xlu0 %v369_v3  ;;  %121 = vmatprep.subr.mxu0 %v104_v6  ;;  %v97_v15 = vld [vmem:[#allocation5 + $0xb0] sm:$0xff]  ;;  %v96_v16 = vld [vmem:[#allocation5 + $0xa8] sm:$0xff]  ;;  %v95_v17 = vld [vmem:[#allocation5 + $0xa0] sm:$0xff]  ;;  %v111_v63 = vsub.s32 0, %v110_v62  ;;  %v115_v1 = vsub.s32 1, %v110_v62 }
  0x22   :  { %122 = vmatpush1.msra.mxu0 %v103_v7  ;;  %223 = vmatprep.subr.mxu1 %v104_v6  ;;  %v94_v18 = vld [vmem:[#allocation5 + $0x98] sm:$0xff]  ;;  %v93_v19 = vld [vmem:[#allocation5 + $0x90] sm:$0xff]  ;;  %v92_v20 = vld [vmem:[#allocation5 + $0x88] sm:$0xff] }
  0x23   :  { %53 = vadd.xlane.f32.xlu1 %v51_v9  ;;  %123 = vmatprep.subr.mxu0 %v102_v8  ;;  %v91_v21 = vld [vmem:[#allocation5 + $0x80] sm:$0xff]  ;;  %v90_v22 = vld [vmem:[#allocation5 + $0x78] sm:$0xff]  ;;  %v89_v23 = vld [vmem:[#allocation5 + $0x70] sm:$0xff] }
  0x24   :  { %124 = vmatpush1.msra.mxu0 %v101_v10  ;;  %239 = vmatpush1.msra.mxu1 %v103_v7  ;;  %v88_v24 = vld [vmem:[#allocation5 + $0x68] sm:$0xff]  ;;  %v87_v25 = vld [vmem:[#allocation5 + $0x60] sm:$0xff]  ;;  %v86_v26 = vld [vmem:[#allocation5 + $0x58] sm:$0xff] }
  0x25   :  { %49 = vadd.xlane.f32.xlu0 %v371_v4  ;;  %224 = vmatprep.subr.mxu1 %v102_v8  ;;  %v85_v27 = vld [vmem:[#allocation5 + $0x50] sm:$0xff]  ;;  %v84_v28 = vld [vmem:[#allocation5 + $0x48] sm:$0xff]  ;;  %v83_v29 = vld [vmem:[#allocation5 + $0x40] sm:$0xff] }
  0x26   :  { %240 = vmatpush1.msra.mxu1 %v101_v10  ;;  %125 = vmatprep.subr.mxu0 %v100_v12  ;;  %v82_v30 = vld [vmem:[#allocation5 + $0x38] sm:$0xff]  ;;  %v81_v31 = vld [vmem:[#allocation5 + $0x30] sm:$0xff]  ;;  %v80_v32 = vld [vmem:[#allocation5 + $0x28] sm:$0xff] }
  0x27   :  { %55 = vadd.xlane.f32.xlu1 %v52_v11  ;;  %225 = vmatprep.subr.mxu1 %v100_v12  ;;  %v79_v33 = vld [vmem:[#allocation5 + $0x20] sm:$0xff]  ;;  %v78_v34 = vld [vmem:[#allocation5 + $0x18] sm:$0xff]  ;;  %v77_v35 = vld [vmem:[#allocation5 + $0x10] sm:$0xff] }
  0x28   :  { %126 = vmatpush1.msra.mxu0 %v99_v13  ;;  %241 = vmatpush1.msra.mxu1 %v99_v13  ;;  %v76_v36 = vld [vmem:[#allocation5 + $0x8] sm:$0xff]  ;;  %v75_v37 = vld [vmem:[#allocation5] sm:$0xff]  ;;  %v107_v0 = vld [vmem:[%s392_s2] sm:$0x3]  ;;  %s306_s2 = scalar_lea.vmem %s210_s27, 512 }
  0x29   :  { %127 = vmatprep.subr.mxu0 %v98_v14  ;;  %226 = vmatprep.subr.mxu1 %v98_v14  ;;  %v112_v2 = vrot.slane %v107_v0, %v111_v63  ;;  %v116_v5 = vrot.slane %v107_v0, %v115_v1  ;;  %p307_p10 = scmp.ne.s32.totalorder %s210_s27, %s306_s2  ;;  %p312_p12 = scmp.lt.s32.totalorder %s306_s2, %s306_s2 }
  0x2a   :  { %128 = vmatpush1.msra.mxu0 %v97_v15  ;;  %242 = vmatpush1.msra.mxu1 %v97_v15 }
  0x2b   :  { %129 = vmatprep.subr.mxu0 %v96_v16  ;;  %227 = vmatprep.subr.mxu1 %v96_v16  ;;  %p313_p13 = por %p312_p12, %p311_p11 }
  0x2c   :  { %130 = vmatpush1.msra.mxu0 %v95_v17  ;;  %243 = vmatpush1.msra.mxu1 %v95_v17 }
  0x2d   :  { %131 = vmatprep.subr.mxu0 %v94_v18  ;;  %228 = vmatprep.subr.mxu1 %v94_v18  ;;  %p314_p0 = pnand %p313_p13, %p307_p10 }
  0x2e   :  { %132 = vmatpush1.msra.mxu0 %v93_v19  ;;  %244 = vmatpush1.msra.mxu1 %v93_v19 }
  0x2f   :  { %133 = vmatprep.subr.mxu0 %v92_v20  ;;  %229 = vmatprep.subr.mxu1 %v92_v20 }
  0x30   :  { %134 = vmatpush1.msra.mxu0 %v91_v21  ;;  %245 = vmatpush1.msra.mxu1 %v91_v21 }
  0x31   :  { %135 = vmatprep.subr.mxu0 %v90_v22  ;;  %230 = vmatprep.subr.mxu1 %v90_v22 }
  0x32   :  { %136 = vmatpush1.msra.mxu0 %v89_v23  ;;  %246 = vmatpush1.msra.mxu1 %v89_v23 }
  0x33   :  { %137 = vmatprep.subr.mxu0 %v88_v24  ;;  %231 = vmatprep.subr.mxu1 %v88_v24 }
  0x34   :  { %138 = vmatpush1.msra.mxu0 %v87_v25  ;;  %247 = vmatpush1.msra.mxu1 %v87_v25 }
  0x35   :  { %139 = vmatprep.subr.mxu0 %v86_v26  ;;  %232 = vmatprep.subr.mxu1 %v86_v26 }
  0x36   :  { %140 = vmatpush1.msra.mxu0 %v85_v27  ;;  %248 = vmatpush1.msra.mxu1 %v85_v27 }
  0x37   :  { %141 = vmatprep.subr.mxu0 %v84_v28  ;;  %233 = vmatprep.subr.mxu1 %v84_v28 }
  0x38   :  { %142 = vmatpush1.msra.mxu0 %v83_v29  ;;  %249 = vmatpush1.msra.mxu1 %v83_v29 }
  0x39   :  { %143 = vmatprep.subr.mxu0 %v82_v30  ;;  %234 = vmatprep.subr.mxu1 %v82_v30 }
  0x3a   :  { %144 = vmatpush1.msra.mxu0 %v81_v31  ;;  %250 = vmatpush1.msra.mxu1 %v81_v31 }
  0x3b   :  { %145 = vmatprep.subr.mxu0 %v80_v32  ;;  %235 = vmatprep.subr.mxu1 %v80_v32 }
  0x3c   :  { %146 = vmatpush1.msra.mxu0 %v79_v33  ;;  %251 = vmatpush1.msra.mxu1 %v79_v33 }
  0x3d   :  { %147 = vmatprep.subr.mxu0 %v78_v34  ;;  %236 = vmatprep.subr.mxu1 %v78_v34 }
  0x3e   :  { %148 = vmatpush1.msra.mxu0 %v77_v35  ;;  %252 = vmatpush1.msra.mxu1 %v77_v35 }
  0x3f   :  { %149 = vmatprep.subr.mxu0 %v76_v36  ;;  %237 = vmatprep.subr.mxu1 %v76_v36 }
  0x40   :  { %150 = vmatpush1.msra.mxu0 %v75_v37  ;;  %253 = vmatpush1.msra.mxu1 %v75_v37 }
  0xaa   :  { %v48_v39 = vpop.xlane.xlu0 %47 }
  0xab   :  { %v57_v40 = vmul.f32 0.0078125, %v48_v39 }
  0xac   :  { %v54_v41 = vpop.xlane.xlu1 %53 }
  0xad   :  { %v61_v42 = vmul.f32 %v57_v40, %v57_v40  ;;  %v59_v43 = vmul.f32 0.0078125, %v54_v41  ;;  %v67_v55 = vsub.f32 %v369_v3, %v57_v40 }
  0xae   :  { %v50_v44 = vpop.xlane.xlu0 %49 }
  0xaf   :  { %v63_v45 = vsub.f32 %v59_v43, %v61_v42  ;;  %v58_v46 = vmul.f32 0.0078125, %v50_v44 }
  0xb0   :  { %v56_v47 = vpop.xlane.xlu1 %55 }
  0xb1   :  { %v65_v48 = vmax.f32 %v63_v45, 0.0  ;;  %v62_v49 = vmul.f32 %v58_v46, %v58_v46  ;;  %v60_v50 = vmul.f32 0.0078125, %v56_v47  ;;  %v68_v58 = vsub.f32 %v371_v4, %v58_v46 }
  0xb3   :  { %v69_v51 = vadd.f32 1e-05, %v65_v48  ;;  %v64_v52 = vsub.f32 %v60_v50, %v62_v49 }
  0xb5   :  { %262 = vrsqrt.f32 %v69_v51  ;;  %v66_v53 = vmax.f32 %v64_v52, 0.0 }
  0xb7   :  { %v70_v54 = vadd.f32 1e-05, %v66_v53 }
  0xb9   :  { %264 = vrsqrt.f32 %v70_v54 }
  0xc2   :  { %v263_v56 = vpop.eup %262 }
  0xc3   :  { %v73_v57 = vmul.f32 %v263_v56, %v67_v55 }
  0xc5   :  { %184 = vmatmul.mubr.f32.vlgmr.msra.gmra.mxu0 %v73_v57 }
  0xc6   :  { %v265_v59 = vpop.eup %264 }
  0xc7   :  { %v74_v60 = vmul.f32 %v265_v59, %v68_v58 }
  0xc9   :  { %190 = vmatmul.mubr.f32.vlgmr.msra.gmra.mxu1 %v74_v60 }
 0x185   :  { %v185_v6 = vpop.f32.mrf.mxu0 }
 0x186   :  { %v186_v3 = vadd.f32 %v185_v6, %v112_v2 }
 0x187   :  { %v187_v7 = vpop.f32.mrf.mxu0 }
 0x188   :  { %v196_v8 = vmax.f32 %v186_v3, 0.0  ;;  %v188_v9 = vadd.f32 %v187_v7, %v116_v5 }
 0x189   :  { %v191_v4 = vpop.f32.mrf.mxu1 }
 0x18a   :  { %200 = vst [vmem:[#allocation7] sm:$0xff] %v196_v8  ;;  %v197_v10 = vmax.f32 %v188_v9, 0.0  ;;  %v192_v11 = vadd.f32 %v191_v4, %v112_v2 }
 0x18b   :  { %v193_v12 = vpop.f32.mrf.mxu1 }
 0x18c   :  { %201 = vst [vmem:[#allocation7 + $0x8] sm:$0xff] %v197_v10  ;;  %v198_v13 = vmax.f32 %v192_v11, 0.0  ;;  %v194_v14 = vadd.f32 %v193_v12, %v116_v5 }
 0x18e   :  { %202 = vst [vmem:[#allocation7 + $0x10] sm:$0xff] %v198_v13  ;;  %v199_v15 = vmax.f32 %v194_v14, 0.0 }
 0x190   :  { %203 = vst [vmem:[#allocation7 + $0x18] sm:$0xff] %v199_v15 }
 0x191   :  { %317 = shalt.err (!%p314_p0)
}
 0x192   :  { %215 = dma.vmem_to_hbm [thread:$0]  %s210_s27, 512, %s393_s3, [#allocation4], %s336_s22, %s336_s22, %s337_s23  }
 0x193   :  { %330 = dma.done.wait [#allocation4], 512  }
 0x194   :  { %331 = vsyncadd [#allocation4], 4294966784 }
 0x195   :  { %219 = vsyncpa [#allocation3], 1 }
 0x196   :  { %220 = vsyncpa [#allocation6], 1 }
 0x197   :  { %221 = vsyncpa [#allocation4], 1 }

</bundles_post_ra>
